<compile_context>
chip_gen: v7x
topology: tpu7x:2x2x1
jax: 0.10.0
libtpu: 0.0.40
codegen_flags: <defaults>
</compile_context>

<pallas_src>
import math
from functools import partial

import jax
import jax.numpy as jnp
from jax.experimental import pallas as pl
from jax.experimental.pallas import tpu as pltpu


def _round_up(x, m):
    return ((x + m - 1) // m) * m


def _fused_cnn_kernel(x0_ref, mask_ref, w_ref, ba_ref, o_ref, act_ref,
                      *, K, C, Wf, Nf):
    """One grid step == one Conv2d+PReLU layer; activations resident in VMEM.

    x0_ref:   (1, Nf)        f32  padded input image (flattened canvas)
    mask_ref: (1, Nf)        f32  1.0 at interior (real image) lanes, 0 at halo
    w_ref:    (1, C, K*K*C)  bf16 this layer's weight, contraction order (kh,kw,cin)
    ba_ref:   (1, C, 2)      f32  [:, :, 0] = bias, [:, :, 1] = PReLU slope
    o_ref:    (1, Nf)        f32  final output (channel 0 of the last layer)
    act_ref:  (C, Nf)        f32  VMEM scratch, persists across grid steps
    """
    layer = pl.program_id(0)
    P = K // 2

    # Load the network input into the resident slab on the first layer only.
    # Channels 1..C-1 must be zero (first-layer weight is zero-padded over cin,
    # but garbage * 0 could still be NaN, so zero the whole slab explicitly).
    @pl.when(layer == 0)
    def _():
        act_ref[...] = jnp.zeros_like(act_ref)
        act_ref[0:1, :] = x0_ref[...]

    act = act_ref[...]                                    # (C, Nf) f32

    # im2col via lane rolls of the flattened padded canvas: tap (kh, kw) is a
    # uniform flat shift of s = (kh-P)*Wf + (kw-P).  Wrapped lanes only land on
    # halo outputs, which are zeroed by the interior mask below.
    cols = []
    for kh in range(K):
        for kw in range(K):
            s = (kh - P) * Wf + (kw - P)
            sh = (-s) % Nf                                # rolled[p] = act[p + s]
            cols.append(act if sh == 0 else pltpu.roll(act, sh, 1))
    im2col = jnp.concatenate(cols, axis=0).astype(jnp.bfloat16)   # (K*K*C, Nf)

    # Single fused MXU contraction: (C, K*K*C) @ (K*K*C, Nf) -> (C, Nf), f32 acc.
    y = jnp.dot(w_ref[0], im2col, preferred_element_type=jnp.float32)

    # f32 epilogue: bias + PReLU (select form), zero halo lanes to keep the
    # conv zero-padding intact for the next layer.
    bias = ba_ref[0, :, 0:1]                              # (C, 1) broadcast
    alpha = ba_ref[0, :, 1:2]                             # (C, 1) broadcast
    y = y + bias
    y = jnp.where(y >= 0.0, y, alpha * y) * mask_ref[...]

    act_ref[...] = y                                      # feed the next layer

    @pl.when(layer == pl.num_programs(0) - 1)
    def _():
        o_ref[...] = y[0:1, :]                            # channel 0 = final map


def _pack_params(params, C, K):
    """Pack per-layer (HWIO weight, bias, alpha) into uniform per-layer blocks."""
    KKC = K * K * C
    w_list, ba_list = [], []
    for (w, b, a) in params:
        _, _, cin, cout = w.shape
        wt = jnp.transpose(w, (3, 0, 1, 2))               # (cout, K, K, cin)
        wt = jnp.pad(wt, ((0, C - cout), (0, 0), (0, 0), (0, C - cin)))
        w_list.append(wt.reshape(C, KKC))                 # contraction = (kh,kw,cin)
        bias = jnp.pad(b.astype(jnp.float32), (0, C - cout))
        alpha = jnp.full((C,), a, jnp.float32)
        ba_list.append(jnp.stack([bias, alpha], axis=-1))  # (C, 2)
    w_packed = jnp.stack(w_list).astype(jnp.bfloat16)     # (L, C, K*K*C)
    ba_packed = jnp.stack(ba_list).astype(jnp.float32)    # (L, C, 2)
    return w_packed, ba_packed


def cnn_configurable_forward(x, params):
    """x: (H, W) f32 -> (H, W) f32 (matches torch.squeeze of the NCHW output)."""
    H, W = x.shape
    K = params[0][0].shape[0]
    assert K % 2 == 1, "even ksize changes the output size in PyTorch; unsupported"
    # Channel count padded to a sublane multiple so the slab tiles cleanly.
    C = _round_up(max(max(p[0].shape[2], p[0].shape[3]) for p in params), 8)
    L = len(params)
    P = K // 2

    # Lane-dense canvas: holds the zero-padded image; Hf*Wf is a multiple of 128.
    Wf = _round_up(W + 2 * P, 32)
    Hf = _round_up(H + 2 * P, 128 // math.gcd(Wf, 128))
    Nf = Hf * Wf
    KKC = K * K * C

    w_packed, ba_packed = _pack_params(params, C, K)

    canvas = jnp.zeros((Hf, Wf), jnp.float32).at[P:P + H, P:P + W].set(x)
    x0 = canvas.reshape(1, Nf)
    mask = (jnp.zeros((Hf, Wf), jnp.float32)
            .at[P:P + H, P:P + W].set(1.0).reshape(1, Nf))

    kernel = partial(_fused_cnn_kernel, K=K, C=C, Wf=Wf, Nf=Nf)

    out = pl.pallas_call(
        kernel,
        out_shape=jax.ShapeDtypeStruct((1, Nf), jnp.float32),
        grid=(L,),
        in_specs=[
            pl.BlockSpec((1, Nf), lambda l: (0, 0)),          # padded input row
            pl.BlockSpec((1, Nf), lambda l: (0, 0)),          # interior mask
            pl.BlockSpec((1, C, KKC), lambda l: (l, 0, 0)),   # per-layer weight
            pl.BlockSpec((1, C, 2), lambda l: (l, 0, 0)),     # per-layer bias+alpha
        ],
        out_specs=pl.BlockSpec((1, Nf), lambda l: (0, 0)),
        scratch_shapes=[pltpu.VMEM((C, Nf), jnp.float32)],    # resident activation
        compiler_params=pltpu.CompilerParams(
            dimension_semantics=("arbitrary",)),              # layers are sequential
    )(x0, mask, w_packed, ba_packed)

    return out.reshape(Hf, Wf)[P:P + H, P:P + W]


def init_params(key, n_lay, n_chan, ksize):
    """Deterministic init mimicking Conv2d default uniform bound; PReLU a=0.25."""
    params = []
    chans = [(1, n_chan)] + [(n_chan, n_chan)] * n_lay + [(n_chan, 1)]
    for (cin, cout) in chans:
        key, k1, k2 = jax.random.split(key, 3)
        bound = 1.0 / math.sqrt(cin * ksize * ksize)
        w = jax.random.uniform(k1, (ksize, ksize, cin, cout), jnp.float32,
                               -bound, bound)
        b = jax.random.uniform(k2, (cout,), jnp.float32, -bound, bound)
        params.append((w, b, jnp.float32(0.25)))
    return params


def reference_forward(x, params):
    """Pure-JAX/XLA reference (lax.conv, f32 HIGHEST) for validation."""
    h = x[None, :, :, None]                                # NHWC, N=1
    for (w, b, a) in params:
        y = jax.lax.conv_general_dilated(
            h, w, window_strides=(1, 1), padding="SAME",
            dimension_numbers=("NHWC", "HWIO", "NHWC"),
            precision=jax.lax.Precision.HIGHEST)
        y = y + b
        h = jnp.maximum(y, 0.0) + a * jnp.minimum(y, 0.0)
    return h[0, :, :, 0]


if __name__ == "__main__":
    # Config consistent with CNN_configurable(n_lay=2, n_chan=8, ksize=3).
    n_lay, n_chan, ksize = 2, 8, 3
    H, W = 16, 16

    key = jax.random.PRNGKey(0)
    key, kx = jax.random.split(key)
    x = jax.random.normal(kx, (H, W), jnp.float32)
    params = init_params(key, n_lay, n_chan, ksize)

    fwd = jax.jit(cnn_configurable_forward)
    out = jax.block_until_ready(fwd(x, params))
    ref = jax.block_until_ready(reference_forward(x, params))

    assert out.shape == (H, W), out.shape
    max_err = float(jnp.max(jnp.abs(out - ref)))
    # Kernel matmuls run bf16 operands / f32 accumulation (reference is f32 HIGHEST).
    assert max_err < 5e-2, f"mismatch vs reference: {max_err}"

    print("KERNEL_OK")
</pallas_src>

<mosaic_0001>
module attributes {stable_mosaic.version = 11 : i64} {
  func.func @_fused_cnn_kernel(%arg0: i32, %arg1: memref<1x640xf32, #tpu.memory_space<vmem>>, %arg2: memref<1x640xf32, #tpu.memory_space<vmem>>, %arg3: memref<1x8x72xbf16, #tpu.memory_space<vmem>>, %arg4: memref<1x8x2xf32, #tpu.memory_space<vmem>>, %arg5: memref<1x640xf32, #tpu.memory_space<vmem>>, %arg6: memref<8x640xf32, #tpu.memory_space<vmem>>) attributes {dimension_semantics = [#tpu.dimension_semantics<arbitrary>], iteration_bounds = array<i64: 4>, scalar_prefetch = 0 : i64, scratch_operands = 1 : i64, tpu.core_type = #tpu.core_type<tc>, window_params = [{pipeline_mode = #tpu.pipeline_mode<synchronous>, transform_indices = @transform_0, window_bounds = array<i64: 1, 640>}, {pipeline_mode = #tpu.pipeline_mode<synchronous>, transform_indices = @transform_1, window_bounds = array<i64: 1, 640>}, {transform_indices = @transform_2, window_bounds = array<i64: 1, 8, 72>}, {transform_indices = @transform_3, window_bounds = array<i64: 1, 8, 2>}, {pipeline_mode = #tpu.pipeline_mode<synchronous>, transform_indices = @transform_4, window_bounds = array<i64: 1, 640>}]} {
    %c0_i32 = arith.constant 0 : i32
    %0 = arith.cmpi eq, %arg0, %c0_i32 : i32
    %1 = arith.extui %0 : i1 to i32
    %c0_i32_0 = arith.constant 0 : i32
    %2 = arith.cmpi ne, %1, %c0_i32_0 : i32
    scf.if %2 {
      %cst_16 = arith.constant 0.000000e+00 : f32
      %35 = vector.broadcast %cst_16 : f32 to vector<8x640xf32>
      %c0_17 = arith.constant 0 : index
      %c0_18 = arith.constant 0 : index
      %36 = vector.load %arg6[%c0_17, %c0_18] : memref<8x640xf32, #tpu.memory_space<vmem>>, vector<8x640xf32>
      tpu.vector_store %arg6[%c0_17, %c0_18], %35 {strides = array<i32>} : memref<8x640xf32, #tpu.memory_space<vmem>>, vector<8x640xf32>,
      %c0_19 = arith.constant 0 : index
      %c0_20 = arith.constant 0 : index
      %37 = vector.load %arg1[%c0_19, %c0_20] : memref<1x640xf32, #tpu.memory_space<vmem>>, vector<1x640xf32>
      %c0_21 = arith.constant 0 : index
      %c0_22 = arith.constant 0 : index
      %38 = vector.load %arg6[%c0_21, %c0_22] : memref<8x640xf32, #tpu.memory_space<vmem>>, vector<1x640xf32>
      tpu.vector_store %arg6[%c0_21, %c0_22], %37 {strides = array<i32>} : memref<8x640xf32, #tpu.memory_space<vmem>>, vector<1x640xf32>,
    } else {
    }
    %c0 = arith.constant 0 : index
    %c0_1 = arith.constant 0 : index
    %3 = vector.load %arg6[%c0, %c0_1] : memref<8x640xf32, #tpu.memory_space<vmem>>, vector<8x640xf32>
    %c33_i32 = arith.constant 33 : i32
    %4 = tpu.dynamic_rotate %3 by %c33_i32 dim 1 : vector<8x640xf32>, i32 -> vector<8x640xf32>
    %c32_i32 = arith.constant 32 : i32
    %5 = tpu.dynamic_rotate %3 by %c32_i32 dim 1 : vector<8x640xf32>, i32 -> vector<8x640xf32>
    %c31_i32 = arith.constant 31 : i32
    %6 = tpu.dynamic_rotate %3 by %c31_i32 dim 1 : vector<8x640xf32>, i32 -> vector<8x640xf32>
    %c1_i32 = arith.constant 1 : i32
    %7 = tpu.dynamic_rotate %3 by %c1_i32 dim 1 : vector<8x640xf32>, i32 -> vector<8x640xf32>
    %c639_i32 = arith.constant 639 : i32
    %8 = tpu.dynamic_rotate %3 by %c639_i32 dim 1 : vector<8x640xf32>, i32 -> vector<8x640xf32>
    %c609_i32 = arith.constant 609 : i32
    %9 = tpu.dynamic_rotate %3 by %c609_i32 dim 1 : vector<8x640xf32>, i32 -> vector<8x640xf32>
    %c608_i32 = arith.constant 608 : i32
    %10 = tpu.dynamic_rotate %3 by %c608_i32 dim 1 : vector<8x640xf32>, i32 -> vector<8x640xf32>
    %c607_i32 = arith.constant 607 : i32
    %11 = tpu.dynamic_rotate %3 by %c607_i32 dim 1 : vector<8x640xf32>, i32 -> vector<8x640xf32>
    %12 = tpu.concatenate %4, %5, %6, %7, %3, %8, %9, %10, %11 in 0 : vector<8x640xf32>, vector<8x640xf32>, vector<8x640xf32>, vector<8x640xf32>, vector<8x640xf32>, vector<8x640xf32>, vector<8x640xf32>, vector<8x640xf32>, vector<8x640xf32> -> vector<72x640xf32>
    %13 = arith.truncf %12 : vector<72x640xf32> to vector<72x640xbf16>
    %c0_2 = arith.constant 0 : index
    %c0_3 = arith.constant 0 : index
    %c0_4 = arith.constant 0 : index
    %14 = vector.load %arg3[%c0_2, %c0_3, %c0_4] : memref<1x8x72xbf16, #tpu.memory_space<vmem>>, vector<1x8x72xbf16>
    %15 = vector.shape_cast %14 : vector<1x8x72xbf16> to vector<8x72xbf16>
    %cst = arith.constant dense<0.000000e+00> : vector<8x640xf32>
    %16 = tpu.matmul %15, %13, %cst {dimension_numbers = #tpu.dot_dimension_numbers<[1], [0], [0], [1], [0, 0, 1, 1], [], []>} : vector<8x72xbf16>, vector<72x640xbf16>, vector<8x640xf32> -> vector<8x640xf32>
    %c0_5 = arith.constant 0 : index
    %c0_6 = arith.constant 0 : index
    %c0_7 = arith.constant 0 : index
    %17 = vector.load %arg4[%c0_5, %c0_6, %c0_7] : memref<1x8x2xf32, #tpu.memory_space<vmem>>, vector<1x8x1xf32>
    %18 = vector.shape_cast %17 : vector<1x8x1xf32> to vector<8x1xf32>
    %c0_8 = arith.constant 0 : index
    %c0_9 = arith.constant 0 : index
    %c1 = arith.constant 1 : index
    %19 = vector.load %arg4[%c0_8, %c0_9, %c1] : memref<1x8x2xf32, #tpu.memory_space<vmem>>, vector<1x8x1xf32>
    %20 = vector.shape_cast %19 : vector<1x8x1xf32> to vector<8x1xf32>
    %21 = vector.broadcast %18 : vector<8x1xf32> to vector<8x640xf32>
    %22 = arith.addf %16, %21 : vector<8x640xf32>
    %cst_10 = arith.constant 0.000000e+00 : f32
    %23 = vector.broadcast %cst_10 : f32 to vector<8x640xf32>
    %24 = arith.cmpf oge, %22, %23 : vector<8x640xf32>
    %25 = vector.broadcast %20 : vector<8x1xf32> to vector<8x640xf32>
    %26 = arith.mulf %25, %22 : vector<8x640xf32>
    %27 = arith.select %24, %22, %26 : vector<8x640xi1>, vector<8x640xf32>
    %c0_11 = arith.constant 0 : index
    %c0_12 = arith.constant 0 : index
    %28 = vector.load %arg2[%c0_11, %c0_12] : memref<1x640xf32, #tpu.memory_space<vmem>>, vector<1x640xf32>
    %29 = vector.broadcast %28 : vector<1x640xf32> to vector<8x640xf32>
    %30 = arith.mulf %27, %29 : vector<8x640xf32>
    %c0_13 = arith.constant 0 : index
    %c0_14 = arith.constant 0 : index
    %31 = vector.load %arg6[%c0_13, %c0_14] : memref<8x640xf32, #tpu.memory_space<vmem>>, vector<8x640xf32>
    tpu.vector_store %arg6[%c0_13, %c0_14], %30 {strides = array<i32>} : memref<8x640xf32, #tpu.memory_space<vmem>>, vector<8x640xf32>,
    %c3_i32 = arith.constant 3 : i32
    %32 = arith.cmpi eq, %arg0, %c3_i32 : i32
    %33 = arith.extui %32 : i1 to i32
    %c0_i32_15 = arith.constant 0 : i32
    %34 = arith.cmpi ne, %33, %c0_i32_15 : i32
    scf.if %34 {
      %35 = vector.extract_strided_slice %30 {offsets = [0, 0], sizes = [1, 640], strides = [1, 1]} : vector<8x640xf32> to vector<1x640xf32>
      %c0_16 = arith.constant 0 : index
      %c0_17 = arith.constant 0 : index
      %36 = vector.load %arg5[%c0_16, %c0_17] : memref<1x640xf32, #tpu.memory_space<vmem>>, vector<1x640xf32>
      tpu.vector_store %arg5[%c0_16, %c0_17], %35 {strides = array<i32>} : memref<1x640xf32, #tpu.memory_space<vmem>>, vector<1x640xf32>,
    } else {
    }
    return
  }
  func.func @transform_0(%arg0: i32) -> (i32, i32) {
    %c0_i32 = arith.constant 0 : i32
    %c0_i32_0 = arith.constant 0 : i32
    %c0_i32_1 = arith.constant 0 : i32
    return %c0_i32, %c0_i32_0 : i32, i32
  }
  func.func @transform_1(%arg0: i32) -> (i32, i32) {
    %c0_i32 = arith.constant 0 : i32
    %c0_i32_0 = arith.constant 0 : i32
    %c0_i32_1 = arith.constant 0 : i32
    return %c0_i32, %c0_i32_0 : i32, i32
  }
  func.func @transform_2(%arg0: i32) -> (i32, i32, i32) {
    %c0_i32 = arith.constant 0 : i32
    %c0_i32_0 = arith.constant 0 : i32
    %c0_i32_1 = arith.constant 0 : i32
    return %arg0, %c0_i32, %c0_i32_0 : i32, i32, i32
  }
  func.func @transform_3(%arg0: i32) -> (i32, i32, i32) {
    %c0_i32 = arith.constant 0 : i32
    %c0_i32_0 = arith.constant 0 : i32
    %c0_i32_1 = arith.constant 0 : i32
    return %arg0, %c0_i32, %c0_i32_0 : i32, i32, i32
  }
  func.func @transform_4(%arg0: i32) -> (i32, i32) {
    %c0_i32 = arith.constant 0 : i32
    %c0_i32_0 = arith.constant 0 : i32
    %c0_i32_1 = arith.constant 0 : i32
    return %c0_i32, %c0_i32_0 : i32, i32
  }
}

</mosaic_0001>

<bundles_post_ra>
// kernel: cnn_configurable_forward.1
= control target key start
LH: loop header
LB: loop body
LE: loop exit
PB: predicated region body
PF: predicated region fallthrough
CT: control target
= control target key end

     0   :  { %s860_s15 = smov 0   ;;  %s1148_s0 = inlined_call_operand.vmem [shape: f32[1,640], index: 0, kind: input, shape index: {}]   ;;  %s1149_s1 = inlined_call_operand.vmem [shape: f32[1,640], index: 1, kind: input, shape index: {}]   ;;  %s1150_s2 = inlined_call_operand.vmem [shape: bf16[4,8,72], index: 2, kind: input, shape index: {}]   ;;  %s1151_s3 = inlined_call_operand.vmem [shape: f32[4,8,2], index: 3, kind: input, shape index: {}]   ;;  %s1152_s4 = inlined_call_operand.vmem [shape: f32[1,640], index: 4, kind: output, shape index: {}]  }
   0x1 LB: > { %s866_s16 = sadd.s32 4294967295, %s819_s15   ;;  %p676_p0 = scmp.ge.s32.totalorder %s819_s15, 1  ;;  %s819_s15 = sphi %s860_s15, %s14_s15  }
   0x2   : > { %p165_p1 = scmp.lt.s32.totalorder %s819_s15, 5 }
   0x4   : > { %p166_p2 = pnand %p676_p0, %p165_p1 }
   0x5   : > { %p189_p3 = scmp.lt.s32.totalorder (!%p166_p2), %s866_s16, 3  ;;  %p679_p4 = scmp.ne.s32.totalorder (!%p166_p2), %s866_s16, 0 }
   0x6   : > { %169 = sbr.rel (%p166_p2) target bundleno = 430 (0x1ae), region = 36 }
   0xd   : > { %s190_s17 = scalar_select %p189_p3, %s866_s16, 3 }
   0xe   : > { %201 = sbr.rel (%p679_p4) target bundleno = 21 (0x15), region = 40  ;;  %v207_v0 = vld [vmem:[%s1148_s0] sm:$0x1f] (!%p679_p4)  ;;  %v208_v1 = vlaneseq (!%p679_p4)  ;;  %v821_v2 = vmov (!%p679_p4), 0.0  }
   0xf   : > { %s677_s18 = sshll.u32 %s190_s17, 2  ;;  %s678_s19 = sshll.u32 %s190_s17, 3  ;;  %202 = vst [vmem:[#allocation2] sm:$0xff] (!%p679_p4), %v821_v2  ;;  %203 = vst [vmem:[#allocation2 + $0x8] sm:$0xff] (!%p679_p4), %v821_v2 }
  0x10   : > { %s875_s22 = scalar_lea.vmem %s1150_s2, %s677_s18  ;;  %s880_s25 = scalar_lea.vmem %s1151_s3, %s678_s19  ;;  %204 = vst [vmem:[#allocation2 + $0x10] sm:$0xff] (!%p679_p4), %v821_v2  ;;  %205 = vst [vmem:[#allocation2 + $0x18] sm:$0xff] (!%p679_p4), %v821_v2  ;;  %vm210_vm0 = vcmp.lt.s32.totalorder (!%p679_p4), %v208_v1, 640 }
  0x11   : > { %206 = vst [vmem:[#allocation2 + $0x20] sm:$0xff] (!%p679_p4), %v821_v2  ;;  %212 = vst.msk [vmem:[#allocation2] ss:$8 sm:$0xf] (!%p679_p4), %vm210_vm0, %v207_v0 }
  0x12   : > { %213 = vst.msk [vmem:[#allocation2] ss:$8 sm:$0x10] (!%p679_p4), %vm210_vm0, %v207_v0 }
  0x15 PF: > { %s822_s28 = smov 33   ;;  %s823_s29 = smov 32   ;;  %v829_v10 = vmov 0   ;;  %v375_v13 = vld [vmem:[%s880_s25] sm:$0xff]  ;;  %v831_v14 = vmov 1   ;;  %v229_v15 = vlaneseq  ;;  %vm385_vm9 = vcmask 1043456  }
  0x16   : > { %s824_s30 = smov 1   ;;  %s825_s5 = smov 31   ;;  %433 = vmatprep.mubr.bf16.mxu0 %v829_v10  ;;  %474 = vmatprep.mubr.bf16.mxu1 %v829_v10  ;;  %vm381_vm10 = vcmask 588800   ;;  %vm833_vm11 = vmmov 0  }
  0x17   : > { %s826_s6 = smov 127   ;;  %s827_s7 = smov 96   ;;  %810 = vset.pattern.permute.xlu0 %v829_v10  ;;  %811 = vset.pattern.permute.xlu1 %v831_v14  ;;  %v919_v17 = vand.u32 127, %v229_v15 }
  0x18   : > { %v888_v4 = vld [vmem:[#allocation2] sm:$0xff]  ;;  %v890_v5 = vld [vmem:[#allocation2 + $0x8] sm:$0xff]  ;;  %v898_v7 = vld [vmem:[#allocation2 + $0x10] sm:$0xff]  ;;  %s828_s8 = smov 97   ;;  %s830_s9 = smov 95  }
  0x19   : > { %v886_v3 = vld [vmem:[#allocation2 + $0x20] sm:$0xff]  ;;  %v730_v6 = vpack.i.bf16 %v890_v5, %v888_v4  ;;  %v750_v8 = vpack.i.bf16 %v898_v7, %v890_v5  ;;  %v906_v9 = vld [vmem:[#allocation2 + $0x18] sm:$0xff]  ;;  %vm231_vm1 = vcmp.lt.s32.totalorder %v919_v17, 33  ;;  %vm247_vm2 = vcmp.lt.s32.totalorder %v919_v17, 32  ;;  %p685_p5 = scmp.ne.s32.totalorder %s866_s16, 3 }
  0x1a   : > { %227 = vrot.lane.b32.xlu1 %v886_v3, %s822_s28  ;;  %v775_v11 = vpack.i.bf16 %v906_v9, %v898_v7  ;;  %v795_v12 = vpack.i.bf16 %v886_v3, %v906_v9  ;;  %vm279_vm3 = vcmp.lt.s32.totalorder %v919_v17, 1  ;;  %vm263_vm4 = vcmp.lt.s32.totalorder %v919_v17, 31 }
  0x1b   : > { %731 = vrot.lane.b32.xlu0 %v730_v6, %s822_s28  ;;  %vm295_vm5 = vcmp.lt.s32.totalorder %v919_v17, 127  ;;  %vm327_vm6 = vcmp.lt.s32.totalorder %v919_v17, 96  ;;  %vm311_vm7 = vcmp.lt.s32.totalorder %v919_v17, 97  ;;  %vm343_vm8 = vcmp.lt.s32.totalorder %v919_v17, 95 }
  0x1e   : > { %245 = vrot.lane.b32.xlu1 %v886_v3, %s823_s29 }
  0x1f   : > { %736 = vrot.lane.b32.xlu0 %v730_v6, %s823_s29 }
  0x22   : > { %746 = vrot.lane.b32.xlu1 %v730_v6, %s824_s30 }
  0x23   : > { %741 = vrot.lane.b32.xlu0 %v730_v6, %s825_s5 }
  0x26   : > { %277 = vrot.lane.b32.xlu1 %v886_v3, %s824_s30 }
  0x27   : > { %261 = vrot.lane.b32.xlu0 %v886_v3, %s825_s5 }
  0x2a   : > { %285 = vrot.lane.b32.xlu1 %v888_v4, %s826_s6 }
  0x2b   : > { %751 = vrot.lane.b32.xlu0 %v750_v8, %s826_s6 }
  0x2e   : > { %761 = vrot.lane.b32.xlu1 %v750_v8, %s827_s7 }
  0x2f   : > { %756 = vrot.lane.b32.xlu0 %v750_v8, %s828_s8 }
  0x32   : > { %317 = vrot.lane.b32.xlu1 %v888_v4, %s827_s7 }
  0x33   : > { %301 = vrot.lane.b32.xlu0 %v888_v4, %s828_s8 }
  0x36   : > { %337 = vrot.lane.b32.xlu1 %v898_v7, %s830_s9 }
  0x37   : > { %766 = vrot.lane.b32.xlu0 %v730_v6, %s830_s9 }
  0x3a   : > { %776 = vrot.lane.b32.xlu1 %v775_v11, %s823_s29 }
  0x3b   : > { %771 = vrot.lane.b32.xlu0 %v775_v11, %s822_s28 }
  0x3e   : > { %786 = vrot.lane.b32.xlu1 %v775_v11, %s824_s30 }
  0x3f   : > { %781 = vrot.lane.b32.xlu0 %v775_v11, %s825_s5 }
  0x42   : > { %796 = vrot.lane.b32.xlu1 %v795_v12, %s828_s8 }
  0x43   : > { %791 = vrot.lane.b32.xlu0 %v795_v12, %s826_s6 }
  0x46   : > { %806 = vrot.lane.b32.xlu1 %v795_v12, %s830_s9 }
  0x47   : > { %801 = vrot.lane.b32.xlu0 %v795_v12, %s827_s7 }
  0x4a   : > { %529 = vperm.xlu1 %811, %v375_v13  }
  0x4b   : > { %378 = vperm.xlu0 %810, %v375_v13  }
  0x4f   : > { %812 = vset.pattern.permute.xlu0 %v831_v14 }
  0x8c   : > { %v916_v16 = vpop.permute.xlu1 %227 }
  0x8d   : > { %v921_v18 = vpop.permute.xlu0 %731 }
  0x8e   : > { %v734_v19 = vunpack.i.h.bf16 %v921_v18  ;;  %v733_v20 = vunpack.i.l.bf16 %v921_v18 }
  0x90   : > { %v925_v21 = vpop.permute.xlu1 %245  ;;  %v235_v26 = vsel %vm231_vm1, %v733_v20, %v734_v19  ;;  %v236_v27 = vsel %vm231_vm1, %v916_v16, %v733_v20 }
  0x91   : > { %v928_v22 = vpop.permute.xlu0 %736 }
  0x92   : > { %v739_v23 = vunpack.i.h.bf16 %v928_v22  ;;  %v738_v24 = vunpack.i.l.bf16 %v928_v22 }
  0x94   : > { %v933_v25 = vpop.permute.xlu1 %746  ;;  %v251_v30 = vsel %vm247_vm2, %v738_v24, %v739_v23  ;;  %v252_v31 = vsel %vm247_vm2, %v925_v21, %v738_v24 }
  0x95   : > { %v749_v28 = vunpack.i.h.bf16 %v933_v25  ;;  %v748_v29 = vunpack.i.l.bf16 %v933_v25  ;;  %v952_v32 = vpop.permute.xlu0 %741  ;;  %v350_v33 = vpack.c.bf16 %v251_v30, %v235_v26  ;;  %v349_v34 = vpack.c.bf16 %v252_v31, %v236_v27 }
  0x96   : > { %v744_v35 = vunpack.i.h.bf16 %v952_v32  ;;  %v743_v36 = vunpack.i.l.bf16 %v952_v32 }
  0x97   : > { %v283_v37 = vsel %vm279_vm3, %v748_v29, %v749_v28  ;;  %401 = vmatprep.subr.bf16.mxu0 %v350_v33 }
  0x98   : > { %v961_v38 = vpop.permute.xlu1 %277  ;;  %402 = vmatpush1.bf16.msra.mxu0 %v349_v34  ;;  %v267_v39 = vsel %vm263_vm4, %v743_v36, %v744_v35 }
  0x99   : > { %v967_v40 = vpop.permute.xlu0 %261  ;;  %v355_v41 = vpack.c.bf16 %v283_v37, %v267_v39  ;;  %v284_v42 = vsel %vm279_vm3, %v961_v38, %v748_v29 }
  0x9a   : > { %v268_v43 = vsel %vm263_vm4, %v967_v40, %v743_v36 }
  0x9b   : > { %v354_v44 = vpack.c.bf16 %v284_v42, %v268_v43  ;;  %403 = vmatprep.subr.bf16.mxu0 %v355_v41  ;;  %v1044_v41 = vld [vmem:[%s875_s22] sm:$0xf] }
  0x9c   : > { %v975_v45 = vpop.permute.xlu1 %285 }
  0x9d   : > { %v977_v46 = vpop.permute.xlu0 %751  ;;  %404 = vmatpush1.bf16.msra.mxu0 %v354_v44 }
  0x9e   : > { %v754_v47 = vunpack.i.h.bf16 %v977_v46  ;;  %v753_v48 = vunpack.i.l.bf16 %v977_v46 }
  0xa0   : > { %v982_v49 = vpop.permute.xlu1 %761  ;;  %v298_v52 = vsel %vm295_vm5, %v753_v48, %v754_v47  ;;  %v299_v53 = vsel %vm295_vm5, %v975_v45, %v753_v48  ;;  %v832_v48 = vmov 0.0  }
  0xa1   : > { %v764_v50 = vunpack.i.h.bf16 %v982_v49  ;;  %v763_v51 = vunpack.i.l.bf16 %v982_v49  ;;  %v994_v54 = vpop.permute.xlu0 %756  ;;  %v360_v55 = vpack.c.bf16 %v298_v52, %v890_v5  ;;  %v359_v56 = vpack.c.bf16 %v299_v53, %v888_v4 }
  0xa2   : > { %v759_v57 = vunpack.i.h.bf16 %v994_v54  ;;  %v758_v58 = vunpack.i.l.bf16 %v994_v54 }
  0xa3   : > { %v330_v59 = vsel %vm327_vm6, %v763_v51, %v764_v50  ;;  %405 = vmatprep.subr.bf16.mxu0 %v360_v55 }
  0xa4   : > { %v1005_v60 = vpop.permute.xlu1 %317  ;;  %406 = vmatpush1.bf16.msra.mxu0 %v359_v56  ;;  %v314_v61 = vsel %vm311_vm7, %v758_v58, %v759_v57 }
  0xa5   : > { %v1011_v62 = vpop.permute.xlu0 %301  ;;  %v365_v63 = vpack.c.bf16 %v330_v59, %v314_v61  ;;  %v331_v0 = vsel %vm327_vm6, %v1005_v60, %v763_v51 }
  0xa6   : > { %v315_v1 = vsel %vm311_vm7, %v1011_v62, %v758_v58 }
  0xa7   : > { %v364_v2 = vpack.c.bf16 %v331_v0, %v315_v1  ;;  %407 = vmatprep.subr.bf16.mxu0 %v365_v63 }
  0xa8   : > { %v1019_v4 = vpop.permute.xlu1 %337 }
  0xa9   : > { %v1022_v5 = vpop.permute.xlu0 %766  ;;  %408 = vmatpush1.bf16.msra.mxu0 %v364_v2 }
  0xaa   : > { %v769_v6 = vunpack.i.h.bf16 %v1022_v5  ;;  %v768_v8 = vunpack.i.l.bf16 %v1022_v5 }
  0xac   : > { %v777_v10 = vpop.permute.xlu1 %776  ;;  %v346_v11 = vsel %vm343_vm8, %v769_v6, %v1019_v4  ;;  %v347_v14 = vsel %vm343_vm8, %v768_v8, %v769_v6 }
  0xad   : > { %v779_v12 = vunpack.i.h.bf16 %v777_v10  ;;  %v778_v13 = vunpack.i.l.bf16 %v777_v10  ;;  %v370_v20 = vpack.c.bf16 %v346_v11, %v346_v11  ;;  %v772_v24 = vpop.permute.xlu0 %771  ;;  %v369_v26 = vpack.c.bf16 %v347_v14, %v347_v14 }
  0xae   : > { %v774_v27 = vunpack.i.h.bf16 %v772_v24  ;;  %v773_v29 = vunpack.i.l.bf16 %v772_v24 }
  0xaf   : > { %v249_v30 = vsel %vm247_vm2, %v778_v13, %v779_v12  ;;  %v248_v31 = vsel %vm247_vm2, %v779_v12, %v925_v21  ;;  %680 = vmatprep.subr.msk.bf16.mxu0 %vm385_vm9, %v370_v20  ;;  %v387_v34 = vsel %vm385_vm9, %v369_v26, 0 }
  0xb0   : > { %v787_v33 = vpop.permute.xlu1 %786  ;;  %v232_v36 = vsel %vm231_vm1, %v774_v27, %v916_v16  ;;  %410 = vmatpush1.bf16.msra.mxu0 %v387_v34  ;;  %v233_v42 = vsel %vm231_vm1, %v773_v29, %v774_v27  ;;  %v234_v51 = vsel %vm231_vm1, %v734_v19, %v773_v29  ;;  %v250_v16 = vsel %vm247_vm2, %v739_v23, %v778_v13 }
  0xb1   : > { %v789_v37 = vunpack.i.h.bf16 %v787_v33  ;;  %v788_v39 = vunpack.i.l.bf16 %v787_v33  ;;  %v353_v43 = vpack.c.bf16 %v248_v31, %v232_v36  ;;  %v782_v21 = vpop.permute.xlu0 %781  ;;  %v352_v44 = vpack.c.bf16 %v249_v30, %v233_v42  ;;  %694 = vmatprep.subr.bf16.mxu0 %v832_v48  ;;  %v542_v33 = vld [vmem:[%s1149_s1] sm:$0x1f] }
  0xb2   : > { %v784_v52 = vunpack.i.h.bf16 %v782_v21  ;;  %v783_v53 = vunpack.i.l.bf16 %v782_v21  ;;  %v351_v55 = vpack.c.bf16 %v250_v16, %v234_v51  ;;  %vm630_vm1 = vcmp.lt.s32.totalorder (!%p685_p5), %v229_v15, 640 }
  0xb3   : > { %v280_v56 = vsel %vm279_vm3, %v789_v37, %v961_v38  ;;  %681 = vmatmul.mubr.msk.bf16.vlgmr.msra.gmra.mrb[0].mxu0 %vm381_vm10, %v1044_v41  ;;  %442 = vmatprep.subr.bf16.mxu1 %v352_v44  ;;  %v281_v18 = vsel %vm279_vm3, %v788_v39, %v789_v37  ;;  %v282_v23 = vsel %vm279_vm3, %v749_v28, %v788_v39 }
  0xb4   : > { %v797_v58 = vpop.permute.xlu1 %796  ;;  %v264_v19 = vsel %vm263_vm4, %v784_v52, %v967_v40  ;;  %443 = vmatpush1.bf16.msra.mxu1 %v351_v55  ;;  %695 = vmatpush3.bf16.msra.mxu0 %v353_v43  ;;  %v265_v22 = vsel %vm263_vm4, %v783_v53, %v784_v52  ;;  %v266_v40 = vsel %vm263_vm4, %v744_v35, %v783_v53 }
  0xb5   : > { %v358_v38 = vpack.c.bf16 %v280_v56, %v264_v19  ;;  %v792_v59 = vpop.permute.xlu0 %791  ;;  %v357_v61 = vpack.c.bf16 %v281_v18, %v265_v22  ;;  %696 = vmatprep.subr.bf16.mxu0 %v832_v48  ;;  %704 = vmatprep.mubr.msk.bf16.mxu0 %vm833_vm11, %v832_v48  ;;  %v356_v1 = vpack.c.bf16 %v282_v23, %v266_v40  ;;  %v799_v25 = vunpack.i.h.bf16 %v797_v58 }
  0xb6   : > { %v794_v63 = vunpack.i.h.bf16 %v792_v59  ;;  %v793_v0 = vunpack.i.l.bf16 %v792_v59  ;;  %v798_v2 = vunpack.i.l.bf16 %v797_v58 }
  0xb7   : > { %444 = vmatprep.subr.bf16.mxu1 %v357_v61 }
  0xb8   : > { %v807_v6 = vpop.permute.xlu1 %806  ;;  %v300_v28 = vsel %vm295_vm5, %v794_v63, %v975_v45  ;;  %445 = vmatpush1.bf16.msra.mxu1 %v356_v1  ;;  %697 = vmatpush3.bf16.msra.mxu0 %v358_v38  ;;  %v296_v32 = vsel %vm295_vm5, %v793_v0, %v794_v63  ;;  %v297_v14 = vsel %vm295_vm5, %v754_v47, %v793_v0 }
  0xb9   : > { %v809_v10 = vunpack.i.h.bf16 %v807_v6  ;;  %v808_v11 = vunpack.i.l.bf16 %v807_v6  ;;  %v363_v35 = vpack.c.bf16 %v300_v28, %v886_v3  ;;  %v802_v12 = vpop.permute.xlu0 %801  ;;  %v362_v13 = vpack.c.bf16 %v296_v32, %v906_v9  ;;  %698 = vmatprep.subr.bf16.mxu0 %v832_v48 }
  0xba   : > { %v312_v45 = vsel %vm311_vm7, %v798_v2, %v799_v25  ;;  %v804_v24 = vunpack.i.h.bf16 %v802_v12  ;;  %v803_v26 = vunpack.i.l.bf16 %v802_v12  ;;  %v361_v3 = vpack.c.bf16 %v297_v14, %v898_v7 }
  0xbb   : > { %v344_v20 = vsel %vm343_vm8, %v808_v11, %v809_v10  ;;  %v316_v9 = vsel %vm311_vm7, %v799_v25, %v1011_v62  ;;  %446 = vmatprep.subr.bf16.mxu1 %v362_v13  ;;  %v313_v46 = vsel %vm311_vm7, %v759_v57, %v798_v2  ;;  %v345_v47 = vsel %vm343_vm8, %v1019_v4, %v808_v11 }
  0xbc   : > { %v348_v27 = vsel %vm343_vm8, %v809_v10, %v768_v8  ;;  %v332_v7 = vsel %vm327_vm6, %v804_v24, %v1005_v60  ;;  %447 = vmatpush1.bf16.msra.mxu1 %v361_v3  ;;  %699 = vmatpush3.bf16.msra.mxu0 %v363_v35  ;;  %v328_v54 = vsel %vm327_vm6, %v803_v26, %v804_v24 }
  0xbd   : > { %v329_v57 = vsel %vm327_vm6, %v764_v50, %v803_v26  ;;  %v372_v62 = vpack.c.bf16 %v344_v20, %v344_v20  ;;  %v368_v4 = vpack.c.bf16 %v332_v7, %v316_v9  ;;  %v367_v5 = vpack.c.bf16 %v328_v54, %v312_v45  ;;  %700 = vmatprep.subr.bf16.mxu0 %v832_v48 }
  0xbe   : > { %v366_v8 = vpack.c.bf16 %v329_v57, %v313_v46  ;;  %v371_v29 = vpack.c.bf16 %v345_v47, %v345_v47  ;;  %v373_v30 = vpack.c.bf16 %v348_v27, %v348_v27  ;;  %v1129_v50 = vshrl.u32 %v229_v15, 7 }
  0xbf   : > { %448 = vmatprep.subr.bf16.mxu1 %v367_v5  ;;  %v834_v26 = vmov (!%p685_p5), 1966171168  }
  0xc0   : > { %449 = vmatpush1.bf16.msra.mxu1 %v366_v8  ;;  %701 = vmatpush3.bf16.msra.mxu0 %v368_v4  ;;  %v393_v49 = vsel %vm385_vm9, %v371_v29, 0  ;;  %v399_v17 = vsel %vm385_vm9, %v373_v30, 0  ;;  %v546_v31 = vsub.s32 0, %v1129_v50  ;;  %v550_v34 = vsub.s32 1, %v1129_v50 }
  0xc1   : > { %682 = vmatprep.subr.msk.bf16.mxu1 %vm385_vm9, %v372_v62  ;;  %702 = vmatprep.subr.bf16.mxu0 %v832_v48  ;;  %v554_v58 = vsub.s32 2, %v1129_v50  ;;  %v562_v18 = vsub.s32 4, %v1129_v50  ;;  %v558_v19 = vsub.s32 3, %v1129_v50  ;;  %v591_v3 = vunpack.c.l.s4 (!%p685_p5), %v834_v26 }
  0xc2   : > { %v547_v21 = vrot.slane %v542_v33, %v546_v31 }
  0xc3   : > { %v555_v63 = vrot.slane %v542_v33, %v554_v58  ;;  %v563_v0 = vrot.slane %v542_v33, %v562_v18  ;;  %v559_v25 = vrot.slane %v542_v33, %v558_v19  ;;  %v592_v47 = vunpack.c.0.s8 (!%p685_p5), %v591_v3 }
  0xc4   : > { %451 = vmatpush1.bf16.msra.mxu1 %v393_v49  ;;  %703 = vmatpush3.bf16.msra.mxu0 %v399_v17 }
  0xc5   : > { %v595_v27 = vsub.s32 (!%p685_p5), %v592_v47, %v1129_v50 }
  0xc7   : > { %683 = vmatmul.mubr.msk.bf16.vlgmr.msra.gmra.mrb[0].mxu1 %vm381_vm10, %v1044_v41  ;;  %705 = vmatmul.mubr.msk.bf16.vlgmr.msra.gmra.mrb[4].mxu0 %vm381_vm10, %v1044_v41  ;;  %v551_v41 = vrot.slane %v542_v33, %v550_v34 }
  0xc9   : > { %v530_v37 = vpop.permute.xlu1 %529 }
  0xca   : > { %v379_v60 = vpop.permute.xlu0 %378 }
 0x186   : > { %v435_v36 = vpop.f32.mrb[0].mxu0 }
 0x187   : > { %v436_v39 = vadd.f32 %v435_v36, %v379_v60  ;;  %v437_v42 = vpop.f32.mrb[1].mxu0 }
 0x188   : > { %v438_v43 = vadd.f32 %v437_v42, %v379_v60  ;;  %v439_v44 = vpop.f32.mrb[2].mxu0 }
 0x189   : > { %vm523_vm12 = vcmp.ge.f32.partialorder %v436_v39, 0.0  ;;  %v532_v48 = vmul.f32 %v530_v37, %v436_v39  ;;  %v440_v51 = vpop.f32.mrb[3].mxu0 }
 0x18a   : > { %vm524_vm13 = vcmp.ge.f32.partialorder %v438_v43, 0.0  ;;  %v533_v16 = vmul.f32 %v530_v37, %v438_v43 }
 0x18b   : > { %v537_v52 = vsel %vm523_vm12, %v436_v39, %v532_v48 }
 0x18c   : > { %v538_v53 = vsel %vm524_vm13, %v438_v43, %v533_v16  ;;  %v569_v55 = vmul.f32 %v547_v21, %v537_v52 }
 0x18d   : > { %v570_v56 = vmul.f32 %v551_v41, %v538_v53 }
 0x18e   : > { %574 = vst [vmem:[#allocation2] sm:$0xff] %v569_v55 }
 0x18f   : > { %575 = vst [vmem:[#allocation2 + $0x8] sm:$0xff] %v570_v56  ;;  %v588_v9 = vcombine.low (!%p685_p5), %v569_v55, %v570_v56 }
 0x191   : > { %v596_v7 = vrot.slane (!%p685_p5), %v588_v9, %v595_v27 }
 0x19a   : > { %v476_v22 = vpop.f32.mrb[0].mxu1  ;;  %v517_v23 = vpop.f32.mrb[4].mxu0 }
 0x19b   : > { %v477_v38 = vadd.f32 %v476_v22, %v379_v60  ;;  %v518_v59 = vadd.f32 %v517_v23, %v379_v60  ;;  %v478_v61 = vpop.f32.mrb[1].mxu1  ;;  %v706_v40 = vpop.f32.mrb[5].mxu0 }
 0x19c   : > { %v479_v1 = vadd.f32 %v478_v61, %v379_v60  ;;  %v480_v2 = vpop.f32.mrb[2].mxu1  ;;  %v520_v6 = vpop.f32.mrb[6].mxu0 }
 0x19d   : > { %vm525_vm14 = vcmp.ge.f32.partialorder %v477_v38, 0.0  ;;  %v534_v28 = vmul.f32 %v530_v37, %v477_v38  ;;  %vm527_vm15 = vcmp.ge.f32.partialorder %v518_v59, 0.0  ;;  %v536_v10 = vmul.f32 %v530_v37, %v518_v59  ;;  %v481_v11 = vpop.f32.mrb[3].mxu1  ;;  %v707_v32 = vpop.f32.mrb[7].mxu0  ;;  %582 = sbr.rel (%p685_p5) target bundleno = 430 (0x1ae), region = 44 }
 0x19e   : > { %vm526_vm0 = vcmp.ge.f32.partialorder %v479_v1, 0.0  ;;  %v535_v35 = vmul.f32 %v530_v37, %v479_v1 }
 0x19f   : > { %v539_v12 = vsel %vm525_vm14, %v477_v38, %v534_v28  ;;  %v541_v13 = vsel %vm527_vm15, %v518_v59, %v536_v10 }
 0x1a0   : > { %v571_v14 = vmul.f32 %v555_v63, %v539_v12  ;;  %v573_v45 = vmul.f32 %v563_v0, %v541_v13  ;;  %v540_v20 = vsel %vm526_vm0, %v479_v1, %v535_v35 }
 0x1a1   : > { %v572_v24 = vmul.f32 %v559_v25, %v540_v20 }
 0x1a2   : > { %576 = vst [vmem:[#allocation2 + $0x10] sm:$0xff] %v571_v14  ;;  %578 = vst [vmem:[#allocation2 + $0x20] sm:$0xff] %v573_v45  ;;  %v610_v57 = vrot.slane (!%p685_p5), %v573_v45, %v595_v27 }
 0x1a3   : > { %577 = vst [vmem:[#allocation2 + $0x18] sm:$0xff] %v572_v24  ;;  %v589_v46 = vcombine.low (!%p685_p5), %v571_v14, %v572_v24 }
 0x1a4   : > { %v625_v4 = vrot.slane %v610_v57, %v595_v27 }
 0x1a5   : > { %v603_v54 = vrot.slane %v589_v46, %v595_v27 }
 0x1a7   : > { %v611_v62 = vcombine.low %v596_v7, %v603_v54 }
 0x1a9   : > { %v618_v5 = vrot.slane %v611_v62, %v595_v27 }
 0x1ab   : > { %v626_v8 = vcombine.low %v618_v5, %v625_v4 }
 0x1ad   : > { %632 = vst.msk [vmem:[%s1152_s4] sm:$0x1f] %vm630_vm1, %v626_v8 }
 0x1ae PF: > { %s14_s15 = sadd.s32 1, %s819_s15  }
 0x1af   : > { %p11_p6 = scmp.ge.s32.totalorder %s14_s15, 6  }
 0x1b1   :  { %13 = sbr.rel (!%p11_p6) target bundleno = 1 (0x1), region = 73 }

</bundles_post_ra>
